<compile_context>
chip_gen: v5e
topology: v5e:2x2
jax: 0.10.0
libtpu: 0.0.40
codegen_flags: <defaults>
</compile_context>

<pallas_src>
import functools

import jax
import jax.numpy as jnp
from jax import lax
from jax.experimental import pallas as pl
from jax.experimental.pallas import tpu as pltpu

EPS = 1e-8      # eps used by fusionlab's iou_score
_LANE = 128


def _round_up(x, m):
    return ((x + m - 1) // m) * m


def _round_down(x, m):
    return (x // m) * m


def _vmem_capacity_bytes():
    """Generation-aware VMEM capacity (falls back to the smallest, v7x's 64 MiB/TC)."""
    try:
        info = pltpu.get_tpu_info()
        cap = getattr(info, "vmem_capacity_bytes", None)
        if cap:
            return int(cap)
    except Exception:
        pass
    return 64 << 20


def _choose_tiling(C, L, logit_bytes, label_bytes, vmem_cap):
    """Pick (tile, chunk): lane tile per grid step and the inner-loop chunk width.

    chunk bounds the live (C, chunk) f32 temporaries to a handful of vregs;
    tile is sized so one grid step streams MiBs of logits (double-buffered)
    within a VMEM budget derived from the chip's capacity.
    """
    chunk = min(512, max(_LANE, _round_down(4096 // max(C, 1), _LANE)))
    lane_cap = _round_up(L, _LANE)
    if lane_cap <= chunk:
        return lane_cap, lane_cap           # tiny spatial extent: one chunk is the tile

    budget = min(vmem_cap // 4, 16 << 20)   # input-stream budget for one grid step
    per_lane = 2 * (C * logit_bytes + label_bytes)   # double-buffered logits + labels
    tile = _round_down(budget // per_lane, chunk)
    tile = max(chunk, min(tile, _round_up(L, chunk)))
    return tile, chunk


def _fold_lanes(x):
    """(C, W) -> (C, 128) by summing 128-wide lane groups (W static multiple of 128).

    Slices at multiples of 128 are plain vreg selections (no relayout); the
    single cross-lane reduce is deferred to the JAX wrapper.
    """
    _, w = x.shape
    acc = x[:, :_LANE]
    for j in range(1, w // _LANE):
        acc = acc + x[:, j * _LANE:(j + 1) * _LANE]
    return acc


def _iou_kernel(logits_ref, labels_ref, inter_ref, card_ref, *,
                tile, chunk, valid_len, n_tiles):
    t = pl.program_id(1)

    # Per-batch output blocks stay resident across the spatial (t) axis:
    # zero them at the start of each batch element's reduction.
    @pl.when(t == 0)
    def _init():
        inter_ref[...] = jnp.zeros_like(inter_ref)
        card_ref[...] = jnp.zeros_like(card_ref)

    C = logits_ref.shape[0]

    def accumulate(start, n_valid=None):
        """Softmax + one-hot for one (C, chunk) slice, folded into the (C,128) accumulators."""
        x = logits_ref[:, pl.ds(start, chunk)].astype(jnp.float32)   # (C, chunk)
        lab = labels_ref[:, pl.ds(start, chunk)]                     # (1, chunk) int32

        # softmax over the class axis (full C resident on sublanes)
        m = jnp.max(x, axis=0, keepdims=True)
        e = jnp.exp(x - m)
        s = jnp.sum(e, axis=0, keepdims=True)
        r = pl.reciprocal(s, approx=True)        # EUP slot (free alongside the exps)
        r = r * (2.0 - s * r)                    # one Newton step -> f32-accurate
        p = e * r                                # (C, chunk) probabilities

        eq = lab == lax.broadcasted_iota(jnp.int32, (C, chunk), 0)   # one-hot (bool)

        if n_valid is not None:                  # ragged trailing lanes only
            valid = lax.broadcasted_iota(jnp.int32, (1, chunk), 1) < n_valid
            p = jnp.where(valid, p, 0.0)         # garbage logits -> zero contribution
            eq = jnp.logical_and(eq, valid)      # garbage labels may alias real classes

        inter_ref[...] += _fold_lanes(jnp.where(eq, p, 0.0))         # p * one_hot
        card_ref[...] += _fold_lanes(p + eq.astype(jnp.float32))     # p + one_hot

    def run_chunks(n):
        """n dense (unmasked) chunks starting at lane 0 of this tile."""
        if n <= 0:
            return
        if n <= 8:
            # short: static starts -> static, tile-aligned slices
            for j in range(n):
                accumulate(j * chunk)
        else:
            # long: rolled loop, 128-aligned dynamic lane offsets
            def body(j, carry):
                accumulate(pl.multiple_of(j * chunk, chunk))
                return carry
            lax.fori_loop(0, n, body, 0)

    n_chunks = tile // chunk
    rem = valid_len - (n_tiles - 1) * tile       # valid lanes in the last tile (static)

    def last_tile():
        run_chunks(rem // chunk)                 # dense chunks of the last tile
        if rem % chunk:                          # one masked partial chunk (static start)
            accumulate((rem // chunk) * chunk, rem % chunk)
        # chunks entirely past valid_len are skipped outright

    if rem == tile:
        # every tile is dense -> single unmasked path, no per-element masking at all
        run_chunks(n_chunks)
    elif n_tiles == 1:
        last_tile()
    else:
        # masking is gated to the last spatial tile only
        @pl.when(t < n_tiles - 1)
        def _full():
            run_chunks(n_chunks)

        @pl.when(t == n_tiles - 1)
        def _last():
            last_tile()


def iou_score_multiclass(y_pred, y_true, *, reduction="none"):
    """Pallas implementation of IoUScore(mode='multiclass', from_logits=True)."""
    N, C, H, W = y_pred.shape
    assert y_true.shape == (N, H, W)
    L = H * W

    # Stream logits in their source dtype (bf16 stays bf16); cast per chunk in-kernel.
    logits = y_pred.reshape(N, C, L)
    labels = y_true.reshape(N, 1, L).astype(jnp.int32)   # no-op for int32 inputs

    logit_bytes = jnp.dtype(logits.dtype).itemsize
    label_bytes = jnp.dtype(labels.dtype).itemsize
    vmem_cap = _vmem_capacity_bytes()
    tile, chunk = _choose_tiling(C, L, logit_bytes, label_bytes, vmem_cap)
    n_tiles = pl.cdiv(L, tile)

    in_bytes = 2 * tile * (C * logit_bytes + label_bytes)   # double-buffered input blocks
    vmem_limit = int(min(vmem_cap * 3 // 4, max(32 << 20, in_bytes + (8 << 20))))

    kernel = functools.partial(_iou_kernel, tile=tile, chunk=chunk,
                               valid_len=L, n_tiles=n_tiles)

    # TODO(synk): explicit dual-TensorCore spatial split (grid=(N, P, T)) for v7x at
    # small batch is not implemented; only the batch axis is marked parallel.
    inter_part, card_part = pl.pallas_call(
        kernel,
        out_shape=(jax.ShapeDtypeStruct((N, C, _LANE), jnp.float32),
                   jax.ShapeDtypeStruct((N, C, _LANE), jnp.float32)),
        grid_spec=pltpu.PrefetchScalarGridSpec(
            num_scalar_prefetch=0,
            grid=(N, n_tiles),
            in_specs=[
                pl.BlockSpec((None, C, tile), lambda n, t: (n, 0, t)),
                pl.BlockSpec((None, 1, tile), lambda n, t: (n, 0, t)),
            ],
            out_specs=[
                pl.BlockSpec((None, C, _LANE), lambda n, t: (n, 0, 0)),
                pl.BlockSpec((None, C, _LANE), lambda n, t: (n, 0, 0)),
            ],
        ),
        compiler_params=pltpu.CompilerParams(
            dimension_semantics=("parallel", "arbitrary"),
            vmem_limit_bytes=vmem_limit),
    )(logits, labels)

    # Final cross-lane / cross-batch reduction and the ratio, in plain JAX (f32).
    inter = inter_part.sum(axis=(0, 2))              # (C,)
    card = card_part.sum(axis=(0, 2))                # (C,) = sum(p + onehot)
    scores = inter / (card - inter + EPS)            # reduction='none' -> (C,)

    if reduction == "none":
        return scores
    return jnp.mean(scores)
    # TODO(synk): mode='binary' (sigmoid + single-channel flatten) not implemented;
    # the module's default multiclass path is what is reproduced here.


def _reference(y_pred, y_true):
    """Pure-JAX mirror of the PyTorch forward."""
    N, C = y_pred.shape[:2]
    p = jax.nn.softmax(y_pred.astype(jnp.float32), axis=1).reshape(N, C, -1)
    t = jax.nn.one_hot(y_true.reshape(N, -1), C, dtype=jnp.float32).transpose(0, 2, 1)
    inter = jnp.sum(p * t, axis=(0, 2))
    union = jnp.sum(p + t, axis=(0, 2)) - inter
    return inter / (union + EPS)


if __name__ == "__main__":
    key = jax.random.PRNGKey(0)

    # Exercise all kernel paths at small shapes:
    #   dense single chunk / ragged masked chunk / short static chunk loop + masked
    #   tail / long rolled (fori_loop) chunk loop + masked tail.
    cases = [
        (2, 4, 16, 16),     # L=256   : nominal module shape, dense single chunk
        (1, 3, 7, 13),      # L=91    : ragged, masked partial chunk
        (2, 5, 48, 48),     # L=2304  : static chunk loop + masked tail
        (2, 4, 104, 104),   # L=10816 : rolled fori_loop chunk path + masked tail
    ]
    for idx, (N, C, H, W) in enumerate(cases):
        k1, k2 = jax.random.split(jax.random.fold_in(key, idx))
        y_pred = jax.random.normal(k1, (N, C, H, W), dtype=jnp.float32)
        y_true = jax.random.randint(k2, (N, H, W), 0, C, dtype=jnp.int32)

        scores = jax.block_until_ready(iou_score_multiclass(y_pred, y_true))
        ref = _reference(y_pred, y_true)

        assert scores.shape == (C,)
        assert jnp.allclose(scores, ref, atol=1e-5, rtol=1e-5), (idx, scores, ref)

    print("KERNEL_OK")
</pallas_src>

<mosaic_0001>
module attributes {stable_mosaic.version = 11 : i64} {
  func.func @_iou_kernel(%arg0: i32, %arg1: i32, %arg2: memref<1x4x256xf32, #tpu.memory_space<vmem>>, %arg3: memref<1x1x256xi32, #tpu.memory_space<vmem>>, %arg4: memref<1x4x128xf32, #tpu.memory_space<vmem>>, %arg5: memref<1x4x128xf32, #tpu.memory_space<vmem>>) attributes {dimension_semantics = [#tpu.dimension_semantics<parallel>, #tpu.dimension_semantics<arbitrary>], iteration_bounds = array<i64: 2, 1>, scalar_prefetch = 0 : i64, scratch_operands = 0 : i64, tpu.core_type = #tpu.core_type<tc>, window_params = [{transform_indices = @transform_0, window_bounds = array<i64: 1, 4, 256>}, {transform_indices = @transform_1, window_bounds = array<i64: 1, 1, 256>}, {transform_indices = @transform_2, window_bounds = array<i64: 1, 4, 128>}, {transform_indices = @transform_3, window_bounds = array<i64: 1, 4, 128>}]} {
    %c0_i32 = arith.constant 0 : i32
    %0 = arith.cmpi eq, %arg1, %c0_i32 : i32
    %1 = arith.extui %0 : i1 to i32
    %c0_i32_0 = arith.constant 0 : i32
    %2 = arith.cmpi ne, %1, %c0_i32_0 : i32
    scf.if %2 {
      %cst_21 = arith.constant 0.000000e+00 : f32
      %47 = vector.broadcast %cst_21 : f32 to vector<4x128xf32>
      %c0_22 = arith.constant 0 : index
      %c0_23 = arith.constant 0 : index
      %c0_24 = arith.constant 0 : index
      %48 = vector.load %arg4[%c0_22, %c0_23, %c0_24] : memref<1x4x128xf32, #tpu.memory_space<vmem>>, vector<1x4x128xf32>
      %49 = vector.shape_cast %48 : vector<1x4x128xf32> to vector<4x128xf32>
      %50 = vector.shape_cast %47 : vector<4x128xf32> to vector<1x4x128xf32>
      tpu.vector_store %arg4[%c0_22, %c0_23, %c0_24], %50 {strides = array<i32>} : memref<1x4x128xf32, #tpu.memory_space<vmem>>, vector<1x4x128xf32>,
      %cst_25 = arith.constant 0.000000e+00 : f32
      %51 = vector.broadcast %cst_25 : f32 to vector<4x128xf32>
      %c0_26 = arith.constant 0 : index
      %c0_27 = arith.constant 0 : index
      %c0_28 = arith.constant 0 : index
      %52 = vector.load %arg5[%c0_26, %c0_27, %c0_28] : memref<1x4x128xf32, #tpu.memory_space<vmem>>, vector<1x4x128xf32>
      %53 = vector.shape_cast %52 : vector<1x4x128xf32> to vector<4x128xf32>
      %54 = vector.shape_cast %51 : vector<4x128xf32> to vector<1x4x128xf32>
      tpu.vector_store %arg5[%c0_26, %c0_27, %c0_28], %54 {strides = array<i32>} : memref<1x4x128xf32, #tpu.memory_space<vmem>>, vector<1x4x128xf32>,
    } else {
    }
    %c0 = arith.constant 0 : index
    %c0_1 = arith.constant 0 : index
    %c0_2 = arith.constant 0 : index
    %3 = vector.load %arg2[%c0, %c0_1, %c0_2] : memref<1x4x256xf32, #tpu.memory_space<vmem>>, vector<1x4x256xf32>
    %4 = vector.shape_cast %3 : vector<1x4x256xf32> to vector<4x256xf32>
    %c0_3 = arith.constant 0 : index
    %c0_4 = arith.constant 0 : index
    %c0_5 = arith.constant 0 : index
    %5 = vector.load %arg3[%c0_3, %c0_4, %c0_5] : memref<1x1x256xi32, #tpu.memory_space<vmem>>, vector<1x1x256xi32>
    %6 = vector.shape_cast %5 : vector<1x1x256xi32> to vector<1x256xi32>
    %cst = arith.constant dense<0xFF800000> : vector<256xf32>
    %7 = vector.multi_reduction <maximumf>, %4, %cst [0] : vector<4x256xf32> to vector<256xf32>
    %8 = vector.shape_cast %7 : vector<256xf32> to vector<1x256xf32>
    %9 = vector.broadcast %8 : vector<1x256xf32> to vector<4x256xf32>
    %10 = arith.subf %4, %9 : vector<4x256xf32>
    %11 = math.exp %10 : vector<4x256xf32>
    %cst_6 = arith.constant dense<0.000000e+00> : vector<256xf32>
    %12 = vector.multi_reduction <add>, %11, %cst_6 [0] : vector<4x256xf32> to vector<256xf32>
    %13 = vector.shape_cast %12 : vector<256xf32> to vector<1x256xf32>
    %14 = tpu.reciprocal %13 {approx = true} : vector<1x256xf32> -> vector<1x256xf32>
    %15 = arith.mulf %13, %14 : vector<1x256xf32>
    %cst_7 = arith.constant 2.000000e+00 : f32
    %16 = vector.broadcast %cst_7 : f32 to vector<1x256xf32>
    %17 = arith.subf %16, %15 : vector<1x256xf32>
    %18 = arith.mulf %14, %17 : vector<1x256xf32>
    %19 = vector.broadcast %18 : vector<1x256xf32> to vector<4x256xf32>
    %20 = arith.mulf %11, %19 : vector<4x256xf32>
    %21 = tpu.iota {dimensions = array<i32: 0>} : vector<4x256xi32>
    %22 = vector.broadcast %6 : vector<1x256xi32> to vector<4x256xi32>
    %23 = arith.cmpi eq, %22, %21 : vector<4x256xi32>
    %c0_8 = arith.constant 0 : index
    %c0_9 = arith.constant 0 : index
    %c0_10 = arith.constant 0 : index
    %24 = vector.load %arg4[%c0_8, %c0_9, %c0_10] : memref<1x4x128xf32, #tpu.memory_space<vmem>>, vector<1x4x128xf32>
    %25 = vector.shape_cast %24 : vector<1x4x128xf32> to vector<4x128xf32>
    %cst_11 = arith.constant 0.000000e+00 : f32
    %26 = vector.broadcast %cst_11 : f32 to vector<4x256xf32>
    %27 = arith.select %23, %20, %26 : vector<4x256xi1>, vector<4x256xf32>
    %28 = vector.extract_strided_slice %27 {offsets = [0, 0], sizes = [4, 128], strides = [1, 1]} : vector<4x256xf32> to vector<4x128xf32>
    %29 = vector.extract_strided_slice %27 {offsets = [0, 128], sizes = [4, 128], strides = [1, 1]} : vector<4x256xf32> to vector<4x128xf32>
    %30 = arith.addf %28, %29 : vector<4x128xf32>
    %31 = arith.addf %25, %30 : vector<4x128xf32>
    %c0_12 = arith.constant 0 : index
    %c0_13 = arith.constant 0 : index
    %c0_14 = arith.constant 0 : index
    %32 = vector.load %arg4[%c0_12, %c0_13, %c0_14] : memref<1x4x128xf32, #tpu.memory_space<vmem>>, vector<1x4x128xf32>
    %33 = vector.shape_cast %32 : vector<1x4x128xf32> to vector<4x128xf32>
    %34 = vector.shape_cast %31 : vector<4x128xf32> to vector<1x4x128xf32>
    tpu.vector_store %arg4[%c0_12, %c0_13, %c0_14], %34 {strides = array<i32>} : memref<1x4x128xf32, #tpu.memory_space<vmem>>, vector<1x4x128xf32>,
    %c0_15 = arith.constant 0 : index
    %c0_16 = arith.constant 0 : index
    %c0_17 = arith.constant 0 : index
    %35 = vector.load %arg5[%c0_15, %c0_16, %c0_17] : memref<1x4x128xf32, #tpu.memory_space<vmem>>, vector<1x4x128xf32>
    %36 = vector.shape_cast %35 : vector<1x4x128xf32> to vector<4x128xf32>
    %37 = arith.extui %23 : vector<4x256xi1> to vector<4x256xi32>
    %38 = arith.sitofp %37 : vector<4x256xi32> to vector<4x256xf32>
    %39 = arith.addf %20, %38 : vector<4x256xf32>
    %40 = vector.extract_strided_slice %39 {offsets = [0, 0], sizes = [4, 128], strides = [1, 1]} : vector<4x256xf32> to vector<4x128xf32>
    %41 = vector.extract_strided_slice %39 {offsets = [0, 128], sizes = [4, 128], strides = [1, 1]} : vector<4x256xf32> to vector<4x128xf32>
    %42 = arith.addf %40, %41 : vector<4x128xf32>
    %43 = arith.addf %36, %42 : vector<4x128xf32>
    %c0_18 = arith.constant 0 : index
    %c0_19 = arith.constant 0 : index
    %c0_20 = arith.constant 0 : index
    %44 = vector.load %arg5[%c0_18, %c0_19, %c0_20] : memref<1x4x128xf32, #tpu.memory_space<vmem>>, vector<1x4x128xf32>
    %45 = vector.shape_cast %44 : vector<1x4x128xf32> to vector<4x128xf32>
    %46 = vector.shape_cast %43 : vector<4x128xf32> to vector<1x4x128xf32>
    tpu.vector_store %arg5[%c0_18, %c0_19, %c0_20], %46 {strides = array<i32>} : memref<1x4x128xf32, #tpu.memory_space<vmem>>, vector<1x4x128xf32>,
    return
  }
  func.func @transform_0(%arg0: i32, %arg1: i32) -> (i32, i32, i32) {
    %c0_i32 = arith.constant 0 : i32
    %c0_i32_0 = arith.constant 0 : i32
    return %arg0, %c0_i32, %arg1 : i32, i32, i32
  }
  func.func @transform_1(%arg0: i32, %arg1: i32) -> (i32, i32, i32) {
    %c0_i32 = arith.constant 0 : i32
    %c0_i32_0 = arith.constant 0 : i32
    return %arg0, %c0_i32, %arg1 : i32, i32, i32
  }
  func.func @transform_2(%arg0: i32, %arg1: i32) -> (i32, i32, i32) {
    %c0_i32 = arith.constant 0 : i32
    %c0_i32_0 = arith.constant 0 : i32
    %c0_i32_1 = arith.constant 0 : i32
    return %arg0, %c0_i32, %c0_i32_0 : i32, i32, i32
  }
  func.func @transform_3(%arg0: i32, %arg1: i32) -> (i32, i32, i32) {
    %c0_i32 = arith.constant 0 : i32
    %c0_i32_0 = arith.constant 0 : i32
    %c0_i32_1 = arith.constant 0 : i32
    return %arg0, %c0_i32, %c0_i32_0 : i32, i32, i32
  }
}

</mosaic_0001>

<bundles_post_ra>
// kernel: tpu_custom_call.1
= control target key start
LH: loop header
LB: loop body
LE: loop exit
PB: predicated region body
PF: predicated region fallthrough
CT: control target
= control target key end

     0   :  { %9 = vsyncpa [#allocation3], 0  ;;  %s1032_s0 = inlined_call_operand.hbm [shape: f32[2,4,256], index: 0, kind: input, shape index: {}]   ;;  %s1033_s1 = inlined_call_operand.hbm [shape: s32[2,1,256], index: 1, kind: input, shape index: {}]   ;;  %s1034_s2 = inlined_call_operand.hbm [shape: f32[2,4,128], index: 2, kind: output, shape index: {0}]   ;;  %s1035_s3 = inlined_call_operand.hbm [shape: f32[2,4,128], index: 3, kind: output, shape index: {1}]  }
   0x1   :  { %11 = vsyncpa [#allocation3 + $0x1], 0 }
   0x2   :  { %12 = vsyncpa [#allocation6], 0 }
   0x3   :  { %14 = vsyncpa [#allocation6 + $0x1], 0 }
   0x4   :  { %15 = vsyncpa [#allocation4], 0 }
   0x5   :  { %17 = vsyncpa [#allocation4 + $0x1], 0 }
   0x6   :  { %18 = vsyncpa [#allocation9], 0 }
   0x7   :  { %20 = vsyncpa [#allocation9 + $0x1], 0  ;;  %s844_s12 = smov 0   ;;  %s846_s13 = smov 0  }
   0x8   :  { %s848_s14 = smov 0   ;;  %s850_s15 = smov 0  }
   0x9   :  { %s852_s16 = smov 0   ;;  %s854_s17 = smov 0  }
   0xa LB: > { %s541_s18 = sadd.s32 4294967295, %s821_s17   ;;  %s542_s19 = sadd.s32 4294967294, %s821_s17   ;;  %s821_s17 = sphi %s854_s17, %s26_s17   ;;  %s817_s16 = sphi %s852_s16, %s1049_s16   ;;  %s813_s15 = sphi %s850_s15, %s1048_s15   ;;  %s809_s14 = sphi %s848_s14, %s1047_s14   ;;  %s805_s13 = sphi %s846_s13, %s1046_s13   ;;  %s801_s12 = sphi %s844_s12, %s1045_s12  }
   0xb   : > { %s38_s20 = sadd.s32 1, %s817_s16  ;;  %s47_s21 = sadd.s32 1, %s809_s14 }
   0xc   : > { %p40_p0 = scmp.ge.s32.totalorder %s38_s20, 2  ;;  %p54_p1 = scmp.ne.s32.totalorder %s809_s14, %s805_s13 }
   0xd   : > { %p55_p2 = scmp.eq.s32.totalorder %s821_s17, 0  ;;  %p60_p3 = scmp.ne.s32.totalorder %s805_s13, %s801_s12 }
   0xe   : > { %s1051_s20 = smov (%p40_p0, %s38_s20), 0  ;;  %p61_p5 = scmp.eq.s32.totalorder %s541_s18, 0 }
   0xf   : > { %p885_p4 = por %p55_p2, %p54_p1  ;;  %s42_s23 = ssub.s32 %s817_s16, %s1051_s20 }
  0x10   : > { %p112_p6 = scmp.eq.s32.totalorder %s541_s18, 1  ;;  %p45_p7 = scmp.eq.s32.totalorder %s42_s23, 0 }
  0x11   : > { %p891_p8 = por %p61_p5, %p60_p3  ;;  %p118_p10 = scmp.eq.s32.totalorder %s542_s19, 1 }
  0x12   : > { %p895_p9 = por %p112_p6, %p54_p1  ;;  %p544_p12 = scmp.ge.s32.totalorder %s821_s17, 2 }
  0x13   : > { %s900_s26 = scalar_select %p45_p7, %s809_s14, %s47_s21  }
  0x14   : > { %p902_p11 = por %p118_p10, %p60_p3  ;;  %p586_p13 = scmp.lt.s32.totalorder %s821_s17, 2 }
  0x15   : > { %s164_s28 = sand.u32 1, %s809_s14   ;;  %s563_s30 = sshll.u32 %s817_s16, 3 }
  0x16   : > { %s545_s29 = sshll.u32 %s164_s28, 3  ;;  %s175_s6 = scalar_lea.hbm %s1032_s0, %s563_s30 }
  0x17   : > { %s168_s7 = scalar_lea.vmem [#allocation2], %s545_s29  ;;  %s177_s9 = sshll.u32 %s175_s6, 4  ;;  %s178_s9 = int_to_ptr.hbm [resolvable:$true] %s177_s9 }
  0x18   : > { %s179_s8 = sshll.u32 %s168_s7, 4  ;;  %p915_p0 = pnand %p586_p13, %p885_p4  ;;  %s180_s8 = int_to_ptr.vmem [resolvable:$true] %s179_s8 }
  0x19   : > { %p550_p1 = scmp.ge.s32.totalorder %s821_s17, 1  ;;  %p205_p2 = scmp.lt.s32.totalorder %s821_s17, 3 }
  0x1a   : > { %s165_s11 = scalar_lea.sflag [#allocation3], %s164_s28  ;;  %s548_s18 = sshll.u32 %s164_s28, 1 }
  0x1b   : > { %575 = dma.hbm_to_vmem [thread:$0]  (!%p915_p0), %s178_s9, 128, %s180_s8, %s165_s11  }
  0x1c   : > { %p206_p3 = pnand %p550_p1, %p205_p2  ;;  %s549_s19 = sshll.u32 %s817_s16, 1 }
  0x1d   : > { %s196_s29 = scalar_lea.hbm %s1033_s1, %s549_s19  ;;  %s190_s30 = scalar_lea.vmem [#allocation5], %s548_s18 }
  0x1e   : > { %s200_s22 = sshll.u32 %s190_s30, 4  ;;  %s198_s4 = sshll.u32 %s196_s29, 4  ;;  %s201_s22 = int_to_ptr.vmem [resolvable:$true] %s200_s22  ;;  %s199_s4 = int_to_ptr.hbm [resolvable:$true] %s198_s4 }
  0x1f   : > { %s187_s5 = scalar_lea.sflag [#allocation6], %s164_s28  ;;  %209 = sbr.rel (%p206_p3) target bundleno = 145 (0x91), region = 28 }
  0x20   : > { %578 = dma.hbm_to_vmem [thread:$0]  (!%p915_p0), %s199_s4, 32, %s201_s22, %s187_s5  }
  0x21   : > { %s930_s6 = sand.u32 (!%p206_p3), 1, %s805_s13  }
  0x22   : > { %s551_s7 = sshll.u32 (!%p206_p3), %s930_s6, 3  ;;  %s212_s8 = scalar_lea.sflag (!%p206_p3), [#allocation3], %s930_s6 }
  0x23   : > { %s215_s9 = scalar_lea.vmem (!%p206_p3), [#allocation2], %s551_s7 }
  0x24   : > { %784 = dma.done.wait (%p891_p8), %s212_s8, 128  }
  0x25   : > { %786 = vsyncadd (%p891_p8), %s212_s8, 4294967168  ;;  %s552_s28 = sshll.u32 %s930_s6, 1  ;;  %s222_s10 = scalar_lea.sflag [#allocation6], %s930_s6 }
  0x26   : > { %s225_s11 = scalar_lea.vmem [#allocation5], %s552_s28 }
  0x27   : > { %788 = dma.done.wait (%p891_p8), %s222_s10, 32  }
  0x28   : > { %790 = vsyncadd (%p891_p8), %s222_s10, 4294967264  ;;  %s553_s18 = sshll.u32 %s930_s6, 2  ;;  %v267_v0 = vld [vmem:[%s215_s9] sm:$0xff]  ;;  %v268_v1 = vld [vmem:[%s225_s11] sm:$0x3]  ;;  %v332_v2 = vlaneseq  ;;  %v823_v3 = vmov 0.0  }
  0x29   : > { %270 = vst [vmem:[#allocation1] ss:$2 sm:$0xff] %v267_v0  ;;  %s945_s19 = scalar_lea.vmem [#allocation8], %s553_s18  ;;  %v334_v4 = vperm.slane %v268_v1, 0  ;;  %v335_v5 = vperm.slane %v268_v1, 1  ;;  %vm275_vm0 = vcmask 1043456  }
  0x2a   : > { %266 = vst [vmem:[%s945_s19] sm:$0xf] %v823_v3  ;;  %v333_v6 = vshrl.u32 %v332_v2, 7  ;;  %s948_s21 = scalar_lea.vmem [#allocation7], %s553_s18  ;;  %s559_s24 = sshll.u32 %s813_s15, 2 }
  0x2b   : > { %265 = vst [vmem:[%s948_s21] sm:$0xf] %v823_v3  ;;  %s397_s30 = scalar_lea.hbm %s1035_s3, %s559_s24  ;;  %s399_s22 = sshll.u32 %s945_s19, 4  ;;  %s400_s22 = int_to_ptr.vmem [resolvable:$true] %s399_s22 }
  0x2c   : > { %vm951_vm1 = vcmp.eq.s32.totalorder %v334_v4, %v333_v6  ;;  %vm955_vm2 = vcmp.eq.s32.totalorder %v335_v5, %v333_v6  ;;  %s401_s4 = sshll.u32 %s397_s30, 4  ;;  %s385_s5 = sshll.u32 %s948_s21, 4  ;;  %s402_s4 = int_to_ptr.hbm [resolvable:$true] %s401_s4  ;;  %s386_s5 = int_to_ptr.vmem [resolvable:$true] %s385_s5 }
  0x2d   : > { %v555_v13 = vsel %vm951_vm1, 1.0, %v823_v3  ;;  %v556_v14 = vsel %vm955_vm2, 1.0, %v823_v3  ;;  %s383_s15 = scalar_lea.hbm %s1034_s2, %s559_s24  ;;  %s373_s28 = scalar_lea.sflag [#allocation9], %s930_s6 }
  0x2e   : > { %v357_v17 = vrot.slane %v556_v14, 4  ;;  %s387_s9 = sshll.u32 %s383_s15, 4  ;;  %s717_s10 = sshra.s32 %s402_s4, 4  ;;  %s718_s10 = int_to_ptr.hbm [resolvable:$true] %s717_s10  ;;  %s388_s9 = int_to_ptr.hbm [resolvable:$true] %s387_s9 }
  0x2f   : > { %s719_s11 = scalar_lea.hbm %s718_s10, 4  ;;  %p724_p7 = scmp.lt.s32.totalorder %s718_s10, %s1035_s3 }
  0x30   : > { %v271_v7 = vld.sshfl [vmem:[#allocation1] sm:$0xff pattern:$0x75316420]  ;;  %v272_v8 = vld.sshfl [vmem:[#allocation1 + $0x8] sm:$0xff pattern:$0x75316420]  ;;  %v358_v20 = vsel %vm275_vm0, %v555_v13, %v357_v17  ;;  %p720_p4 = scmp.ne.s32.totalorder %s718_s10, %s719_s11 }
  0x31   : > { %v276_v11 = vsel %vm275_vm0, %v271_v7, -inf  ;;  %v283_v12 = vsel %vm275_vm0, %v272_v8, -inf  ;;  %v350_v63 = vld [vmem:[%s945_s19] sm:$0xf] }
  0x32   : > { %v277_v15 = vrot.slane %v276_v11, 4  ;;  %v284_v16 = vrot.slane %v283_v12, 4  ;;  %v338_v4 = vld [vmem:[%s948_s21] sm:$0xf]  ;;  %p721_p5 = pnand %p720_p4, %p895_p9 }
  0x34   : > { %v278_v18 = vmax.f32 %v276_v11, %v277_v15  ;;  %v285_v19 = vmax.f32 %v283_v12, %v284_v16  ;;  %p722_p6 = pneg %p721_p5 }
  0x36   : > { %v279_v21 = vrot.slane %v278_v18, 2  ;;  %v286_v22 = vrot.slane %v285_v19, 2 }
  0x38   : > { %v280_v23 = vmax.f32 %v278_v18, %v279_v21  ;;  %v287_v24 = vmax.f32 %v285_v19, %v286_v22 }
  0x3a   : > { %v281_v25 = vrot.slane %v280_v23, 1  ;;  %v288_v26 = vrot.slane %v287_v24, 1 }
  0x3c   : > { %v289_v27 = vmax.f32 %v287_v24, %v288_v26  ;;  %v282_v28 = vmax.f32 %v280_v23, %v281_v25 }
  0x3e   : > { %v292_v29 = vrot.slane %v289_v27, 4 }
  0x40   : > { %v293_v30 = vsel %vm275_vm0, %v282_v28, %v292_v29 }
  0x41   : > { %v295_v31 = vsub.f32 %v267_v0, %v293_v30 }
  0x43   : > { %v296_v32 = vmul.f32 1.442695, %v295_v31 }
  0x45   : > { %637 = vpow2.f32 %v296_v32 }
  0x4b   : > { %v638_v33 = vpop.eup %637 }
  0x4c   : > { %299 = vst [vmem:[#allocation1] ss:$2 sm:$0xff] %v638_v33 }
  0x53   : > { %v300_v34 = vld.sshfl [vmem:[#allocation1] sm:$0xff pattern:$0x75316420]  ;;  %v301_v35 = vld.sshfl [vmem:[#allocation1 + $0x8] sm:$0xff pattern:$0x75316420] }
  0x54   : > { %v304_v36 = vsel %vm275_vm0, %v300_v34, 0.0  ;;  %v311_v37 = vsel %vm275_vm0, %v301_v35, 0.0 }
  0x55   : > { %v305_v38 = vrot.slane %v304_v36, 4  ;;  %v312_v39 = vrot.slane %v311_v37, 4 }
  0x57   : > { %v306_v40 = vadd.f32 %v305_v38, %v304_v36  ;;  %v313_v41 = vadd.f32 %v312_v39, %v311_v37 }
  0x59   : > { %v307_v42 = vrot.slane %v306_v40, 2  ;;  %v314_v43 = vrot.slane %v313_v41, 2 }
  0x5b   : > { %v308_v44 = vadd.f32 %v307_v42, %v306_v40  ;;  %v315_v45 = vadd.f32 %v314_v43, %v313_v41 }
  0x5d   : > { %v309_v46 = vrot.slane %v308_v44, 1  ;;  %v316_v47 = vrot.slane %v315_v45, 1 }
  0x5f   : > { %v310_v48 = vadd.f32 %v309_v46, %v308_v44  ;;  %v317_v49 = vadd.f32 %v316_v47, %v315_v45 }
  0x61   : > { %639 = vrcp.f32 %v310_v48 }
  0x62   : > { %641 = vrcp.f32 %v317_v49 }
  0x67   : > { %v640_v50 = vpop.eup %639 }
  0x68   : > { %v642_v51 = vpop.eup %641  ;;  %v320_v52 = vmul.f32 %v640_v50, %v310_v48 }
  0x69   : > { %v321_v53 = vmul.f32 %v642_v51, %v317_v49 }
  0x6a   : > { %v322_v54 = vsub.f32 2.0, %v320_v52 }
  0x6b   : > { %v323_v55 = vsub.f32 2.0, %v321_v53 }
  0x6c   : > { %v324_v57 = vmul.f32 %v640_v50, %v322_v54 }
  0x6d   : > { %v325_v56 = vmul.f32 %v642_v51, %v323_v55 }
  0x6f   : > { %v328_v58 = vrot.slane %v325_v56, 4 }
  0x71   : > { %v329_v59 = vsel %vm275_vm0, %v324_v57, %v328_v58 }
  0x72   : > { %v331_v60 = vmul.f32 %v638_v33, %v329_v59 }
  0x74   : > { %340 = vst [vmem:[#allocation1] ss:$2 sm:$0xff] %v331_v60  ;;  %v360_v61 = vadd.f32 %v358_v20, %v331_v60 }
  0x76   : > { %v362_v62 = vrot.slane %v360_v61, 4 }
  0x78   : > { %v364_v0 = vadd.f32 %v362_v62, %v360_v61 }
  0x7a   : > { %v365_v1 = vadd.f32 %v364_v0, %v350_v63 }
  0x7b   : > { %v341_v2 = vld.sshfl [vmem:[#allocation1] sm:$0xff pattern:$0x75316420]  ;;  %v342_v3 = vld.sshfl [vmem:[#allocation1 + $0x8] sm:$0xff pattern:$0x75316420] }
  0x7c   : > { %366 = vst [vmem:[%s945_s19] sm:$0xf] %v365_v1  ;;  %v345_v5 = vsel %vm951_vm1, %v341_v2, 0.0  ;;  %v346_v6 = vsel %vm955_vm2, %v342_v3, 0.0  ;;  %s723_s19 = scalar_lea.hbm %s1035_s3, 8 }
  0x7d   : > { %v347_v7 = vadd.f32 %v346_v6, %v345_v5  ;;  %p725_p8 = scmp.lt.s32.totalorder %s723_s19, %s719_s11 }
  0x7f   : > { %p726_p10 = por %p725_p8, %p724_p7 }
  0x81   : > { %p727_p13 = pnand %p726_p10, %p722_p6 }
  0x83   : > { %730 = shalt.err (!%p727_p13)
}
  0x84   : > { %569 = dma.vmem_to_hbm [thread:$0]  (%p895_p9), %s400_s22, 64, %s402_s4, %s373_s28   ;;  %v348_v8 = vadd.f32 %v347_v7, %v338_v4 }
  0x85   : > { %s368_s30 = scalar_lea.sflag [#allocation4], %s930_s6  ;;  %s745_s7 = sshra.s32 %s388_s9, 4  ;;  %s746_s7 = int_to_ptr.hbm [resolvable:$true] %s745_s7 }
  0x86   : > { %349 = vst [vmem:[%s948_s21] sm:$0xf] %v348_v8  ;;  %s747_s8 = scalar_lea.hbm %s746_s7, 4  ;;  %s751_s11 = scalar_lea.hbm %s1034_s2, 8 }
  0x87   : > { %p748_p0 = scmp.ne.s32.totalorder %s746_s7, %s747_s8  ;;  %p752_p3 = scmp.lt.s32.totalorder %s746_s7, %s1034_s2 }
  0x88   : > { %p753_p4 = scmp.lt.s32.totalorder %s751_s11, %s747_s8 }
  0x89   : > { %p749_p1 = pnand %p748_p0, %p895_p9 }
  0x8a   : > { %p754_p5 = por %p753_p4, %p752_p3 }
  0x8b   : > { %p750_p2 = pneg %p749_p1 }
  0x8d   : > { %p755_p6 = pnand %p754_p5, %p750_p2 }
  0x8f   : > { %758 = shalt.err (!%p755_p6)
}
  0x90   : > { %568 = dma.vmem_to_hbm [thread:$0]  (%p895_p9), %s386_s5, 64, %s388_s9, %s368_s30  }
  0x91 PF: > { %s413_s6 = sand.u32 1, %s801_s12   ;;  %p580_p7 = pnand %p544_p12, %p902_p11 }
  0x92   : > { %s414_s21 = scalar_lea.sflag [#allocation4], %s413_s6 }
  0x93   : > { %p581_p8 = pneg %p580_p7 }
  0x95   : > { %792 = dma.done.wait (%p581_p8), %s414_s21, 64  }
  0x96   : > { %794 = vsyncadd (%p581_p8), %s414_s21, 4294967232  ;;  %s424_s22 = scalar_lea.sflag [#allocation9], %s413_s6 }
  0x97   : > { %796 = dma.done.wait (%p581_p8), %s424_s22, 64  }
  0x98   : > { %798 = vsyncadd (%p581_p8), %s424_s22, 4294967232  ;;  %s26_s17 = sadd.s32 1, %s821_s17   ;;  %s1045_s12 = smov %s805_s13 }
  0x99   : > { %p23_p10 = scmp.ge.s32.totalorder %s26_s17, 4   ;;  %s1046_s13 = smov %s809_s14 }
  0x9a   : > { %s1047_s14 = smov %s900_s26  ;;  %s1048_s15 = smov %s817_s16 }
  0x9b   : > { %s1049_s16 = smov %s1051_s20  ;;  %25 = sbr.rel (!%p23_p10) target bundleno = 10 (0xa), region = 107 }
  0xa0   :  { %430 = vsyncpa [#allocation3], 1 }
  0xa1   :  { %432 = vsyncpa [#allocation3 + $0x1], 1 }
  0xa2   :  { %433 = vsyncpa [#allocation6], 1 }
  0xa3   :  { %435 = vsyncpa [#allocation6 + $0x1], 1 }
  0xa4   :  { %436 = vsyncpa [#allocation4], 1 }
  0xa5   :  { %438 = vsyncpa [#allocation4 + $0x1], 1 }
  0xa6   :  { %439 = vsyncpa [#allocation9], 1 }
  0xa7   :  { %441 = vsyncpa [#allocation9 + $0x1], 1 }

</bundles_post_ra>
